<compile_context>
chip_gen: v7x
topology: tpu7x:2x2x1
jax: 0.10.0
libtpu: 0.0.40
codegen_flags: <defaults>
</compile_context>

<pallas_src>
import jax
import jax.numpy as jnp
from jax import lax
from jax.experimental import pallas as pl
from jax.experimental.pallas import tpu as pltpu

# Model dims (from the PyTorch module)
VOCAB = 24
VOCAB_PAD = 128   # pad the one-hot contraction dim to a full 128-lane vreg
EMB_D = 16
HID = 32
NCLS = 2
NCLS_PAD = 128    # lane-dense classifier output


def lstm_classifier_kernel(onehot_ref, emb_proj_ref, w_hh_ref, fc_w_ref, fc_b_ref,
                           out_ref):
    """Fused embedding + LSTM recurrence + final Linear for one batch tile.

    onehot_ref:   (T, Bt, VOCAB_PAD)   one-hot tokens (matmul dtype), time-major
    emb_proj_ref: (VOCAB_PAD, 4H)      emb @ W_ih^T + (b_ih + b_hh); pad rows = bias
    w_hh_ref:     (H, 4H)              hidden->gates weight (pre-transposed)
    fc_w_ref:     (H, NCLS_PAD)        fc weight (pre-transposed, lane-padded)
    fc_b_ref:     (1, NCLS_PAD)        fc bias (f32, lane-padded)
    out_ref:      (Bt, NCLS_PAD)       logits (f32, lane-padded)
    """
    T, Bt, _ = onehot_ref.shape
    H = w_hh_ref.shape[0]

    emb_proj = emb_proj_ref[...]
    w_hh = w_hh_ref[...]
    mm_dtype = w_hh.dtype

    # Embedding gather + input projection + both biases, as one MXU matmul per
    # step.  No dependence on h/c, so these are free to overlap the recurrence.
    x_proj = [jnp.dot(onehot_ref[t], emb_proj, preferred_element_type=jnp.float32)
              for t in range(T)]                                   # T x (Bt, 4H) f32

    h = jnp.zeros((Bt, H), jnp.float32)
    c = jnp.zeros((Bt, H), jnp.float32)

    # Fully-unrolled recurrence: one (bf16) MXU push per step, two full-128-lane
    # EUP transcendentals, static lane slices for the gate windows.  All
    # elementwise state math stays f32 (v5e has no bf16 VPU/EUP).
    for t in range(T):
        gates = x_proj[t] + jnp.dot(h.astype(mm_dtype), w_hh,
                                    preferred_element_type=jnp.float32)  # (Bt, 4H) f32
        sig = jax.nn.sigmoid(gates)                                      # full 128 lanes
        th = jnp.tanh(gates)                                             # full 128 lanes
        i_g = sig[:, 0 * H:1 * H]
        f_g = sig[:, 1 * H:2 * H]
        g_g = th[:, 2 * H:3 * H]
        o_g = sig[:, 3 * H:4 * H]
        c = f_g * c + i_g * g_g
        h = o_g * jnp.tanh(c)

    # Lane-dense final matmul + unmasked full-vreg store.
    out_ref[...] = (jnp.dot(h.astype(fc_w_ref.dtype), fc_w_ref[...],
                            preferred_element_type=jnp.float32)
                    + fc_b_ref[...])


def lstm_classifier_forward(tokens, params, matmul_dtype=jnp.bfloat16):
    """tokens: (B, T) int.  Returns logits (B, NCLS) float32."""
    B, T = tokens.shape
    if B <= 128:
        B_TILE = ((B + 7) // 8) * 8      # fill f32 sublanes; grid degenerates to (1,)
        B_pad = B_TILE
    else:
        B_TILE = 128                     # batch-parallel tiles (v7x: both TCs)
        B_pad = ((B + 127) // 128) * 128

    # ---- Weight prep (tiny, fuses under jit) ----------------------------------
    # Fold embedding, input projection and both biases into one (VOCAB, 4H) table.
    bias = params["b_ih"] + params["b_hh"]                                  # (4H,)
    emb_proj = params["embedding"] @ params["w_ih"].T + bias[None, :]       # (VOCAB, 4H)
    # Vocab padding rows = bias: an out-of-range token then acts like padding_idx
    # (zero embedding -> bias-only gates) instead of silently zero gates.
    pad_rows = jnp.broadcast_to(bias[None, :], (VOCAB_PAD - VOCAB, 4 * HID))
    emb_proj = jnp.concatenate([emb_proj, pad_rows], axis=0).astype(matmul_dtype)

    w_hh_t = params["w_hh"].T.astype(matmul_dtype)                          # (H, 4H)
    fc_w_t = jnp.zeros((HID, NCLS_PAD), matmul_dtype).at[:, :NCLS].set(
        params["fc_w"].T.astype(matmul_dtype))                              # (H, 128)
    fc_b = jnp.zeros((1, NCLS_PAD), jnp.float32).at[0, :NCLS].set(params["fc_b"])

    # ---- Lane-friendly token feed: time-major one-hot built in the wrapper ----
    tok = tokens.astype(jnp.int32)
    if B_pad != B:
        tok = jnp.pad(tok, ((0, B_pad - B), (0, 0)))       # padded rows use token 0
    tok_tm = tok.T                                          # (T, B_pad)
    onehot = (tok_tm[:, :, None] ==
              jnp.arange(VOCAB_PAD, dtype=jnp.int32)).astype(matmul_dtype)  # (T,B_pad,V)

    out = pl.pallas_call(
        lstm_classifier_kernel,
        out_shape=jax.ShapeDtypeStruct((B_pad, NCLS_PAD), jnp.float32),
        grid=(B_pad // B_TILE,),
        in_specs=[
            pl.BlockSpec((T, B_TILE, VOCAB_PAD), lambda i: (0, i, 0)),
            pl.BlockSpec((VOCAB_PAD, 4 * HID), lambda i: (0, 0)),
            pl.BlockSpec((HID, 4 * HID), lambda i: (0, 0)),
            pl.BlockSpec((HID, NCLS_PAD), lambda i: (0, 0)),
            pl.BlockSpec((1, NCLS_PAD), lambda i: (0, 0)),
        ],
        out_specs=pl.BlockSpec((B_TILE, NCLS_PAD), lambda i: (i, 0)),
        compiler_params=pltpu.CompilerParams(
            dimension_semantics=("parallel",)),
    )(onehot, emb_proj, w_hh_t, fc_w_t, fc_b)

    return out[:B, :NCLS]


def init_params(key):
    """Deterministic init matching the PyTorch module's parameter shapes."""
    k_emb, k1, k2, k3, k4, k5, k6 = jax.random.split(key, 7)
    emb = jax.random.normal(k_emb, (VOCAB, EMB_D), jnp.float32)
    emb = emb.at[0].set(0.0)  # padding_idx=0

    k = 1.0 / jnp.sqrt(jnp.float32(HID))
    u = lambda kk, shape: jax.random.uniform(kk, shape, jnp.float32, -k, k)
    w_ih = u(k1, (4 * HID, EMB_D))
    w_hh = u(k2, (4 * HID, HID))
    b_ih = u(k3, (4 * HID,))
    b_hh = u(k4, (4 * HID,))

    kf = 1.0 / jnp.sqrt(jnp.float32(HID))
    fc_w = jax.random.uniform(k5, (NCLS, HID), jnp.float32, -kf, kf)
    fc_b = jax.random.uniform(k6, (NCLS,), jnp.float32, -kf, kf)

    return dict(embedding=emb, w_ih=w_ih, w_hh=w_hh, b_ih=b_ih, b_hh=b_hh,
                fc_w=fc_w, fc_b=fc_b)


def reference_forward(tokens, params):
    """Pure-JAX reference of the same forward pass (for a sanity check)."""
    x = params["embedding"][tokens]  # (B, T, D)
    B = x.shape[0]
    w_ih_t = params["w_ih"].T
    w_hh_t = params["w_hh"].T
    bias = params["b_ih"] + params["b_hh"]

    def step(carry, x_t):
        h, c = carry
        gates = x_t @ w_ih_t + h @ w_hh_t + bias
        i_g = jax.nn.sigmoid(gates[:, 0 * HID:1 * HID])
        f_g = jax.nn.sigmoid(gates[:, 1 * HID:2 * HID])
        g_g = jnp.tanh(gates[:, 2 * HID:3 * HID])
        o_g = jax.nn.sigmoid(gates[:, 3 * HID:4 * HID])
        c = f_g * c + i_g * g_g
        h = o_g * jnp.tanh(c)
        return (h, c), None

    h0 = jnp.zeros((B, HID), jnp.float32)
    c0 = jnp.zeros((B, HID), jnp.float32)
    (h_last, _), _ = lax.scan(step, (h0, c0), jnp.transpose(x, (1, 0, 2)))
    return h_last @ params["fc_w"].T + params["fc_b"]


if __name__ == "__main__":
    key = jax.random.PRNGKey(0)
    k_params, k_tok = jax.random.split(key)
    params = init_params(k_params)

    B, T = 2, 8
    tokens = jax.random.randint(k_tok, (B, T), 0, VOCAB, dtype=jnp.int32)

    fwd = jax.jit(lstm_classifier_forward, static_argnames=("matmul_dtype",))
    ref = jax.block_until_ready(reference_forward(tokens, params))

    # f32 MXU-operand path: tight check against the pure-JAX reference.
    logits_f32 = jax.block_until_ready(fwd(tokens, params, matmul_dtype=jnp.float32))
    assert logits_f32.shape == (B, NCLS)
    assert jnp.allclose(logits_f32, ref, atol=1e-4, rtol=1e-4), (logits_f32, ref)

    # bf16 MXU-operand path (performance default): looser tolerance, since only
    # the matmul operands are bf16 while all elementwise/state math stays f32.
    logits_bf16 = jax.block_until_ready(fwd(tokens, params))
    assert logits_bf16.shape == (B, NCLS)
    assert jnp.allclose(logits_bf16, ref, atol=3e-2, rtol=3e-2), (logits_bf16, ref)

    print("KERNEL_OK")
</pallas_src>

<mosaic_0001>
module attributes {stable_mosaic.version = 11 : i64} {
  func.func @lstm_classifier_kernel(%arg0: i32, %arg1: memref<8x8x128xf32, #tpu.memory_space<vmem>>, %arg2: memref<128x128xf32, #tpu.memory_space<vmem>>, %arg3: memref<32x128xf32, #tpu.memory_space<vmem>>, %arg4: memref<32x128xf32, #tpu.memory_space<vmem>>, %arg5: memref<1x128xf32, #tpu.memory_space<vmem>>, %arg6: memref<8x128xf32, #tpu.memory_space<vmem>>) attributes {dimension_semantics = [#tpu.dimension_semantics<parallel>], iteration_bounds = array<i64: 1>, scalar_prefetch = 0 : i64, scratch_operands = 0 : i64, tpu.core_type = #tpu.core_type<tc>, window_params = [{transform_indices = @transform_0, window_bounds = array<i64: 8, 8, 128>}, {pipeline_mode = #tpu.pipeline_mode<synchronous>, transform_indices = @transform_1, window_bounds = array<i64: 128, 128>}, {pipeline_mode = #tpu.pipeline_mode<synchronous>, transform_indices = @transform_2, window_bounds = array<i64: 32, 128>}, {pipeline_mode = #tpu.pipeline_mode<synchronous>, transform_indices = @transform_3, window_bounds = array<i64: 32, 128>}, {pipeline_mode = #tpu.pipeline_mode<synchronous>, transform_indices = @transform_4, window_bounds = array<i64: 1, 128>}, {transform_indices = @transform_5, window_bounds = array<i64: 8, 128>}]} {
    %c0 = arith.constant 0 : index
    %c0_0 = arith.constant 0 : index
    %0 = vector.load %arg2[%c0, %c0_0] : memref<128x128xf32, #tpu.memory_space<vmem>>, vector<128x128xf32>
    %c0_1 = arith.constant 0 : index
    %c0_2 = arith.constant 0 : index
    %1 = vector.load %arg3[%c0_1, %c0_2] : memref<32x128xf32, #tpu.memory_space<vmem>>, vector<32x128xf32>
    %c0_3 = arith.constant 0 : index
    %c0_4 = arith.constant 0 : index
    %c0_5 = arith.constant 0 : index
    %2 = vector.load %arg1[%c0_3, %c0_4, %c0_5] : memref<8x8x128xf32, #tpu.memory_space<vmem>>, vector<1x8x128xf32>
    %3 = vector.shape_cast %2 : vector<1x8x128xf32> to vector<8x128xf32>
    %cst = arith.constant dense<0.000000e+00> : vector<8x128xf32>
    %4 = tpu.matmul %3, %0, %cst {dimension_numbers = #tpu.dot_dimension_numbers<[1], [0], [0], [1], [0, 0, 1, 1], [], []>} : vector<8x128xf32>, vector<128x128xf32>, vector<8x128xf32> -> vector<8x128xf32>
    %c1 = arith.constant 1 : index
    %c0_6 = arith.constant 0 : index
    %c0_7 = arith.constant 0 : index
    %5 = vector.load %arg1[%c1, %c0_6, %c0_7] : memref<8x8x128xf32, #tpu.memory_space<vmem>>, vector<1x8x128xf32>
    %6 = vector.shape_cast %5 : vector<1x8x128xf32> to vector<8x128xf32>
    %cst_8 = arith.constant dense<0.000000e+00> : vector<8x128xf32>
    %7 = tpu.matmul %6, %0, %cst_8 {dimension_numbers = #tpu.dot_dimension_numbers<[1], [0], [0], [1], [0, 0, 1, 1], [], []>} : vector<8x128xf32>, vector<128x128xf32>, vector<8x128xf32> -> vector<8x128xf32>
    %c2 = arith.constant 2 : index
    %c0_9 = arith.constant 0 : index
    %c0_10 = arith.constant 0 : index
    %8 = vector.load %arg1[%c2, %c0_9, %c0_10] : memref<8x8x128xf32, #tpu.memory_space<vmem>>, vector<1x8x128xf32>
    %9 = vector.shape_cast %8 : vector<1x8x128xf32> to vector<8x128xf32>
    %cst_11 = arith.constant dense<0.000000e+00> : vector<8x128xf32>
    %10 = tpu.matmul %9, %0, %cst_11 {dimension_numbers = #tpu.dot_dimension_numbers<[1], [0], [0], [1], [0, 0, 1, 1], [], []>} : vector<8x128xf32>, vector<128x128xf32>, vector<8x128xf32> -> vector<8x128xf32>
    %c3 = arith.constant 3 : index
    %c0_12 = arith.constant 0 : index
    %c0_13 = arith.constant 0 : index
    %11 = vector.load %arg1[%c3, %c0_12, %c0_13] : memref<8x8x128xf32, #tpu.memory_space<vmem>>, vector<1x8x128xf32>
    %12 = vector.shape_cast %11 : vector<1x8x128xf32> to vector<8x128xf32>
    %cst_14 = arith.constant dense<0.000000e+00> : vector<8x128xf32>
    %13 = tpu.matmul %12, %0, %cst_14 {dimension_numbers = #tpu.dot_dimension_numbers<[1], [0], [0], [1], [0, 0, 1, 1], [], []>} : vector<8x128xf32>, vector<128x128xf32>, vector<8x128xf32> -> vector<8x128xf32>
    %c4 = arith.constant 4 : index
    %c0_15 = arith.constant 0 : index
    %c0_16 = arith.constant 0 : index
    %14 = vector.load %arg1[%c4, %c0_15, %c0_16] : memref<8x8x128xf32, #tpu.memory_space<vmem>>, vector<1x8x128xf32>
    %15 = vector.shape_cast %14 : vector<1x8x128xf32> to vector<8x128xf32>
    %cst_17 = arith.constant dense<0.000000e+00> : vector<8x128xf32>
    %16 = tpu.matmul %15, %0, %cst_17 {dimension_numbers = #tpu.dot_dimension_numbers<[1], [0], [0], [1], [0, 0, 1, 1], [], []>} : vector<8x128xf32>, vector<128x128xf32>, vector<8x128xf32> -> vector<8x128xf32>
    %c5 = arith.constant 5 : index
    %c0_18 = arith.constant 0 : index
    %c0_19 = arith.constant 0 : index
    %17 = vector.load %arg1[%c5, %c0_18, %c0_19] : memref<8x8x128xf32, #tpu.memory_space<vmem>>, vector<1x8x128xf32>
    %18 = vector.shape_cast %17 : vector<1x8x128xf32> to vector<8x128xf32>
    %cst_20 = arith.constant dense<0.000000e+00> : vector<8x128xf32>
    %19 = tpu.matmul %18, %0, %cst_20 {dimension_numbers = #tpu.dot_dimension_numbers<[1], [0], [0], [1], [0, 0, 1, 1], [], []>} : vector<8x128xf32>, vector<128x128xf32>, vector<8x128xf32> -> vector<8x128xf32>
    %c6 = arith.constant 6 : index
    %c0_21 = arith.constant 0 : index
    %c0_22 = arith.constant 0 : index
    %20 = vector.load %arg1[%c6, %c0_21, %c0_22] : memref<8x8x128xf32, #tpu.memory_space<vmem>>, vector<1x8x128xf32>
    %21 = vector.shape_cast %20 : vector<1x8x128xf32> to vector<8x128xf32>
    %cst_23 = arith.constant dense<0.000000e+00> : vector<8x128xf32>
    %22 = tpu.matmul %21, %0, %cst_23 {dimension_numbers = #tpu.dot_dimension_numbers<[1], [0], [0], [1], [0, 0, 1, 1], [], []>} : vector<8x128xf32>, vector<128x128xf32>, vector<8x128xf32> -> vector<8x128xf32>
    %c7 = arith.constant 7 : index
    %c0_24 = arith.constant 0 : index
    %c0_25 = arith.constant 0 : index
    %23 = vector.load %arg1[%c7, %c0_24, %c0_25] : memref<8x8x128xf32, #tpu.memory_space<vmem>>, vector<1x8x128xf32>
    %24 = vector.shape_cast %23 : vector<1x8x128xf32> to vector<8x128xf32>
    %cst_26 = arith.constant dense<0.000000e+00> : vector<8x128xf32>
    %25 = tpu.matmul %24, %0, %cst_26 {dimension_numbers = #tpu.dot_dimension_numbers<[1], [0], [0], [1], [0, 0, 1, 1], [], []>} : vector<8x128xf32>, vector<128x128xf32>, vector<8x128xf32> -> vector<8x128xf32>
    %cst_27 = arith.constant 0.000000e+00 : f32
    %26 = vector.broadcast %cst_27 : f32 to vector<8x32xf32>
    %cst_28 = arith.constant 0.000000e+00 : f32
    %27 = vector.broadcast %cst_28 : f32 to vector<8x32xf32>
    %cst_29 = arith.constant dense<0.000000e+00> : vector<8x128xf32>
    %28 = tpu.matmul %26, %1, %cst_29 {dimension_numbers = #tpu.dot_dimension_numbers<[1], [0], [0], [1], [0, 0, 1, 1], [], []>} : vector<8x32xf32>, vector<32x128xf32>, vector<8x128xf32> -> vector<8x128xf32>
    %29 = arith.addf %4, %28 : vector<8x128xf32>
    %30 = arith.negf %29 : vector<8x128xf32>
    %31 = math.exp %30 : vector<8x128xf32>
    %cst_30 = arith.constant 1.000000e+00 : f32
    %32 = vector.broadcast %cst_30 : f32 to vector<8x128xf32>
    %33 = arith.addf %32, %31 : vector<8x128xf32>
    %34 = arith.divf %32, %33 : vector<8x128xf32>
    %35 = math.tanh %29 : vector<8x128xf32>
    %36 = vector.extract_strided_slice %34 {offsets = [0, 0], sizes = [8, 32], strides = [1, 1]} : vector<8x128xf32> to vector<8x32xf32>
    %37 = vector.extract_strided_slice %34 {offsets = [0, 32], sizes = [8, 32], strides = [1, 1]} : vector<8x128xf32> to vector<8x32xf32>
    %38 = vector.extract_strided_slice %35 {offsets = [0, 64], sizes = [8, 32], strides = [1, 1]} : vector<8x128xf32> to vector<8x32xf32>
    %39 = vector.extract_strided_slice %34 {offsets = [0, 96], sizes = [8, 32], strides = [1, 1]} : vector<8x128xf32> to vector<8x32xf32>
    %40 = arith.mulf %37, %27 : vector<8x32xf32>
    %41 = arith.mulf %36, %38 : vector<8x32xf32>
    %42 = arith.addf %40, %41 : vector<8x32xf32>
    %43 = math.tanh %42 : vector<8x32xf32>
    %44 = arith.mulf %39, %43 : vector<8x32xf32>
    %cst_31 = arith.constant dense<0.000000e+00> : vector<8x128xf32>
    %45 = tpu.matmul %44, %1, %cst_31 {dimension_numbers = #tpu.dot_dimension_numbers<[1], [0], [0], [1], [0, 0, 1, 1], [], []>} : vector<8x32xf32>, vector<32x128xf32>, vector<8x128xf32> -> vector<8x128xf32>
    %46 = arith.addf %7, %45 : vector<8x128xf32>
    %47 = arith.negf %46 : vector<8x128xf32>
    %48 = math.exp %47 : vector<8x128xf32>
    %cst_32 = arith.constant 1.000000e+00 : f32
    %49 = vector.broadcast %cst_32 : f32 to vector<8x128xf32>
    %50 = arith.addf %49, %48 : vector<8x128xf32>
    %51 = arith.divf %49, %50 : vector<8x128xf32>
    %52 = math.tanh %46 : vector<8x128xf32>
    %53 = vector.extract_strided_slice %51 {offsets = [0, 0], sizes = [8, 32], strides = [1, 1]} : vector<8x128xf32> to vector<8x32xf32>
    %54 = vector.extract_strided_slice %51 {offsets = [0, 32], sizes = [8, 32], strides = [1, 1]} : vector<8x128xf32> to vector<8x32xf32>
    %55 = vector.extract_strided_slice %52 {offsets = [0, 64], sizes = [8, 32], strides = [1, 1]} : vector<8x128xf32> to vector<8x32xf32>
    %56 = vector.extract_strided_slice %51 {offsets = [0, 96], sizes = [8, 32], strides = [1, 1]} : vector<8x128xf32> to vector<8x32xf32>
    %57 = arith.mulf %54, %42 : vector<8x32xf32>
    %58 = arith.mulf %53, %55 : vector<8x32xf32>
    %59 = arith.addf %57, %58 : vector<8x32xf32>
    %60 = math.tanh %59 : vector<8x32xf32>
    %61 = arith.mulf %56, %60 : vector<8x32xf32>
    %cst_33 = arith.constant dense<0.000000e+00> : vector<8x128xf32>
    %62 = tpu.matmul %61, %1, %cst_33 {dimension_numbers = #tpu.dot_dimension_numbers<[1], [0], [0], [1], [0, 0, 1, 1], [], []>} : vector<8x32xf32>, vector<32x128xf32>, vector<8x128xf32> -> vector<8x128xf32>
    %63 = arith.addf %10, %62 : vector<8x128xf32>
    %64 = arith.negf %63 : vector<8x128xf32>
    %65 = math.exp %64 : vector<8x128xf32>
    %cst_34 = arith.constant 1.000000e+00 : f32
    %66 = vector.broadcast %cst_34 : f32 to vector<8x128xf32>
    %67 = arith.addf %66, %65 : vector<8x128xf32>
    %68 = arith.divf %66, %67 : vector<8x128xf32>
    %69 = math.tanh %63 : vector<8x128xf32>
    %70 = vector.extract_strided_slice %68 {offsets = [0, 0], sizes = [8, 32], strides = [1, 1]} : vector<8x128xf32> to vector<8x32xf32>
    %71 = vector.extract_strided_slice %68 {offsets = [0, 32], sizes = [8, 32], strides = [1, 1]} : vector<8x128xf32> to vector<8x32xf32>
    %72 = vector.extract_strided_slice %69 {offsets = [0, 64], sizes = [8, 32], strides = [1, 1]} : vector<8x128xf32> to vector<8x32xf32>
    %73 = vector.extract_strided_slice %68 {offsets = [0, 96], sizes = [8, 32], strides = [1, 1]} : vector<8x128xf32> to vector<8x32xf32>
    %74 = arith.mulf %71, %59 : vector<8x32xf32>
    %75 = arith.mulf %70, %72 : vector<8x32xf32>
    %76 = arith.addf %74, %75 : vector<8x32xf32>
    %77 = math.tanh %76 : vector<8x32xf32>
    %78 = arith.mulf %73, %77 : vector<8x32xf32>
    %cst_35 = arith.constant dense<0.000000e+00> : vector<8x128xf32>
    %79 = tpu.matmul %78, %1, %cst_35 {dimension_numbers = #tpu.dot_dimension_numbers<[1], [0], [0], [1], [0, 0, 1, 1], [], []>} : vector<8x32xf32>, vector<32x128xf32>, vector<8x128xf32> -> vector<8x128xf32>
    %80 = arith.addf %13, %79 : vector<8x128xf32>
    %81 = arith.negf %80 : vector<8x128xf32>
    %82 = math.exp %81 : vector<8x128xf32>
    %cst_36 = arith.constant 1.000000e+00 : f32
    %83 = vector.broadcast %cst_36 : f32 to vector<8x128xf32>
    %84 = arith.addf %83, %82 : vector<8x128xf32>
    %85 = arith.divf %83, %84 : vector<8x128xf32>
    %86 = math.tanh %80 : vector<8x128xf32>
    %87 = vector.extract_strided_slice %85 {offsets = [0, 0], sizes = [8, 32], strides = [1, 1]} : vector<8x128xf32> to vector<8x32xf32>
    %88 = vector.extract_strided_slice %85 {offsets = [0, 32], sizes = [8, 32], strides = [1, 1]} : vector<8x128xf32> to vector<8x32xf32>
    %89 = vector.extract_strided_slice %86 {offsets = [0, 64], sizes = [8, 32], strides = [1, 1]} : vector<8x128xf32> to vector<8x32xf32>
    %90 = vector.extract_strided_slice %85 {offsets = [0, 96], sizes = [8, 32], strides = [1, 1]} : vector<8x128xf32> to vector<8x32xf32>
    %91 = arith.mulf %88, %76 : vector<8x32xf32>
    %92 = arith.mulf %87, %89 : vector<8x32xf32>
    %93 = arith.addf %91, %92 : vector<8x32xf32>
    %94 = math.tanh %93 : vector<8x32xf32>
    %95 = arith.mulf %90, %94 : vector<8x32xf32>
    %cst_37 = arith.constant dense<0.000000e+00> : vector<8x128xf32>
    %96 = tpu.matmul %95, %1, %cst_37 {dimension_numbers = #tpu.dot_dimension_numbers<[1], [0], [0], [1], [0, 0, 1, 1], [], []>} : vector<8x32xf32>, vector<32x128xf32>, vector<8x128xf32> -> vector<8x128xf32>
    %97 = arith.addf %16, %96 : vector<8x128xf32>
    %98 = arith.negf %97 : vector<8x128xf32>
    %99 = math.exp %98 : vector<8x128xf32>
    %cst_38 = arith.constant 1.000000e+00 : f32
    %100 = vector.broadcast %cst_38 : f32 to vector<8x128xf32>
    %101 = arith.addf %100, %99 : vector<8x128xf32>
    %102 = arith.divf %100, %101 : vector<8x128xf32>
    %103 = math.tanh %97 : vector<8x128xf32>
    %104 = vector.extract_strided_slice %102 {offsets = [0, 0], sizes = [8, 32], strides = [1, 1]} : vector<8x128xf32> to vector<8x32xf32>
    %105 = vector.extract_strided_slice %102 {offsets = [0, 32], sizes = [8, 32], strides = [1, 1]} : vector<8x128xf32> to vector<8x32xf32>
    %106 = vector.extract_strided_slice %103 {offsets = [0, 64], sizes = [8, 32], strides = [1, 1]} : vector<8x128xf32> to vector<8x32xf32>
    %107 = vector.extract_strided_slice %102 {offsets = [0, 96], sizes = [8, 32], strides = [1, 1]} : vector<8x128xf32> to vector<8x32xf32>
    %108 = arith.mulf %105, %93 : vector<8x32xf32>
    %109 = arith.mulf %104, %106 : vector<8x32xf32>
    %110 = arith.addf %108, %109 : vector<8x32xf32>
    %111 = math.tanh %110 : vector<8x32xf32>
    %112 = arith.mulf %107, %111 : vector<8x32xf32>
    %cst_39 = arith.constant dense<0.000000e+00> : vector<8x128xf32>
    %113 = tpu.matmul %112, %1, %cst_39 {dimension_numbers = #tpu.dot_dimension_numbers<[1], [0], [0], [1], [0, 0, 1, 1], [], []>} : vector<8x32xf32>, vector<32x128xf32>, vector<8x128xf32> -> vector<8x128xf32>
    %114 = arith.addf %19, %113 : vector<8x128xf32>
    %115 = arith.negf %114 : vector<8x128xf32>
    %116 = math.exp %115 : vector<8x128xf32>
    %cst_40 = arith.constant 1.000000e+00 : f32
    %117 = vector.broadcast %cst_40 : f32 to vector<8x128xf32>
    %118 = arith.addf %117, %116 : vector<8x128xf32>
    %119 = arith.divf %117, %118 : vector<8x128xf32>
    %120 = math.tanh %114 : vector<8x128xf32>
    %121 = vector.extract_strided_slice %119 {offsets = [0, 0], sizes = [8, 32], strides = [1, 1]} : vector<8x128xf32> to vector<8x32xf32>
    %122 = vector.extract_strided_slice %119 {offsets = [0, 32], sizes = [8, 32], strides = [1, 1]} : vector<8x128xf32> to vector<8x32xf32>
    %123 = vector.extract_strided_slice %120 {offsets = [0, 64], sizes = [8, 32], strides = [1, 1]} : vector<8x128xf32> to vector<8x32xf32>
    %124 = vector.extract_strided_slice %119 {offsets = [0, 96], sizes = [8, 32], strides = [1, 1]} : vector<8x128xf32> to vector<8x32xf32>
    %125 = arith.mulf %122, %110 : vector<8x32xf32>
    %126 = arith.mulf %121, %123 : vector<8x32xf32>
    %127 = arith.addf %125, %126 : vector<8x32xf32>
    %128 = math.tanh %127 : vector<8x32xf32>
    %129 = arith.mulf %124, %128 : vector<8x32xf32>
    %cst_41 = arith.constant dense<0.000000e+00> : vector<8x128xf32>
    %130 = tpu.matmul %129, %1, %cst_41 {dimension_numbers = #tpu.dot_dimension_numbers<[1], [0], [0], [1], [0, 0, 1, 1], [], []>} : vector<8x32xf32>, vector<32x128xf32>, vector<8x128xf32> -> vector<8x128xf32>
    %131 = arith.addf %22, %130 : vector<8x128xf32>
    %132 = arith.negf %131 : vector<8x128xf32>
    %133 = math.exp %132 : vector<8x128xf32>
    %cst_42 = arith.constant 1.000000e+00 : f32
    %134 = vector.broadcast %cst_42 : f32 to vector<8x128xf32>
    %135 = arith.addf %134, %133 : vector<8x128xf32>
    %136 = arith.divf %134, %135 : vector<8x128xf32>
    %137 = math.tanh %131 : vector<8x128xf32>
    %138 = vector.extract_strided_slice %136 {offsets = [0, 0], sizes = [8, 32], strides = [1, 1]} : vector<8x128xf32> to vector<8x32xf32>
    %139 = vector.extract_strided_slice %136 {offsets = [0, 32], sizes = [8, 32], strides = [1, 1]} : vector<8x128xf32> to vector<8x32xf32>
    %140 = vector.extract_strided_slice %137 {offsets = [0, 64], sizes = [8, 32], strides = [1, 1]} : vector<8x128xf32> to vector<8x32xf32>
    %141 = vector.extract_strided_slice %136 {offsets = [0, 96], sizes = [8, 32], strides = [1, 1]} : vector<8x128xf32> to vector<8x32xf32>
    %142 = arith.mulf %139, %127 : vector<8x32xf32>
    %143 = arith.mulf %138, %140 : vector<8x32xf32>
    %144 = arith.addf %142, %143 : vector<8x32xf32>
    %145 = math.tanh %144 : vector<8x32xf32>
    %146 = arith.mulf %141, %145 : vector<8x32xf32>
    %cst_43 = arith.constant dense<0.000000e+00> : vector<8x128xf32>
    %147 = tpu.matmul %146, %1, %cst_43 {dimension_numbers = #tpu.dot_dimension_numbers<[1], [0], [0], [1], [0, 0, 1, 1], [], []>} : vector<8x32xf32>, vector<32x128xf32>, vector<8x128xf32> -> vector<8x128xf32>
    %148 = arith.addf %25, %147 : vector<8x128xf32>
    %149 = arith.negf %148 : vector<8x128xf32>
    %150 = math.exp %149 : vector<8x128xf32>
    %cst_44 = arith.constant 1.000000e+00 : f32
    %151 = vector.broadcast %cst_44 : f32 to vector<8x128xf32>
    %152 = arith.addf %151, %150 : vector<8x128xf32>
    %153 = arith.divf %151, %152 : vector<8x128xf32>
    %154 = math.tanh %148 : vector<8x128xf32>
    %155 = vector.extract_strided_slice %153 {offsets = [0, 0], sizes = [8, 32], strides = [1, 1]} : vector<8x128xf32> to vector<8x32xf32>
    %156 = vector.extract_strided_slice %153 {offsets = [0, 32], sizes = [8, 32], strides = [1, 1]} : vector<8x128xf32> to vector<8x32xf32>
    %157 = vector.extract_strided_slice %154 {offsets = [0, 64], sizes = [8, 32], strides = [1, 1]} : vector<8x128xf32> to vector<8x32xf32>
    %158 = vector.extract_strided_slice %153 {offsets = [0, 96], sizes = [8, 32], strides = [1, 1]} : vector<8x128xf32> to vector<8x32xf32>
    %159 = arith.mulf %156, %144 : vector<8x32xf32>
    %160 = arith.mulf %155, %157 : vector<8x32xf32>
    %161 = arith.addf %159, %160 : vector<8x32xf32>
    %162 = math.tanh %161 : vector<8x32xf32>
    %163 = arith.mulf %158, %162 : vector<8x32xf32>
    %c0_45 = arith.constant 0 : index
    %c0_46 = arith.constant 0 : index
    %164 = vector.load %arg4[%c0_45, %c0_46] : memref<32x128xf32, #tpu.memory_space<vmem>>, vector<32x128xf32>
    %cst_47 = arith.constant dense<0.000000e+00> : vector<8x128xf32>
    %165 = tpu.matmul %163, %164, %cst_47 {dimension_numbers = #tpu.dot_dimension_numbers<[1], [0], [0], [1], [0, 0, 1, 1], [], []>} : vector<8x32xf32>, vector<32x128xf32>, vector<8x128xf32> -> vector<8x128xf32>
    %c0_48 = arith.constant 0 : index
    %c0_49 = arith.constant 0 : index
    %166 = vector.load %arg5[%c0_48, %c0_49] : memref<1x128xf32, #tpu.memory_space<vmem>>, vector<1x128xf32>
    %167 = vector.broadcast %166 : vector<1x128xf32> to vector<8x128xf32>
    %168 = arith.addf %165, %167 : vector<8x128xf32>
    %c0_50 = arith.constant 0 : index
    %c0_51 = arith.constant 0 : index
    %169 = vector.load %arg6[%c0_50, %c0_51] : memref<8x128xf32, #tpu.memory_space<vmem>>, vector<8x128xf32>
    tpu.vector_store %arg6[%c0_50, %c0_51], %168 {strides = array<i32>} : memref<8x128xf32, #tpu.memory_space<vmem>>, vector<8x128xf32>,
    return
  }
  func.func @transform_0(%arg0: i32) -> (i32, i32, i32) {
    %c0_i32 = arith.constant 0 : i32
    %c0_i32_0 = arith.constant 0 : i32
    %c0_i32_1 = arith.constant 0 : i32
    return %c0_i32, %arg0, %c0_i32_0 : i32, i32, i32
  }
  func.func @transform_1(%arg0: i32) -> (i32, i32) {
    %c0_i32 = arith.constant 0 : i32
    %c0_i32_0 = arith.constant 0 : i32
    %c0_i32_1 = arith.constant 0 : i32
    return %c0_i32, %c0_i32_0 : i32, i32
  }
  func.func @transform_2(%arg0: i32) -> (i32, i32) {
    %c0_i32 = arith.constant 0 : i32
    %c0_i32_0 = arith.constant 0 : i32
    %c0_i32_1 = arith.constant 0 : i32
    return %c0_i32, %c0_i32_0 : i32, i32
  }
  func.func @transform_3(%arg0: i32) -> (i32, i32) {
    %c0_i32 = arith.constant 0 : i32
    %c0_i32_0 = arith.constant 0 : i32
    %c0_i32_1 = arith.constant 0 : i32
    return %c0_i32, %c0_i32_0 : i32, i32
  }
  func.func @transform_4(%arg0: i32) -> (i32, i32) {
    %c0_i32 = arith.constant 0 : i32
    %c0_i32_0 = arith.constant 0 : i32
    %c0_i32_1 = arith.constant 0 : i32
    return %c0_i32, %c0_i32_0 : i32, i32
  }
  func.func @transform_5(%arg0: i32) -> (i32, i32) {
    %c0_i32 = arith.constant 0 : i32
    %c0_i32_0 = arith.constant 0 : i32
    return %arg0, %c0_i32 : i32, i32
  }
}

</mosaic_0001>

<bundles_post_ra>
// kernel: lstm_classifier_forward.1
= control target key start
LH: loop header
LB: loop body
LE: loop exit
PB: predicated region body
PF: predicated region fallthrough
CT: control target
= control target key end

     0   :  { %v2412_v0 = vmov 0.0|0.0   ;;  %vm2413_vm0 = vmmov 0   ;;  %v2414_v4 = vmov 0.0   ;;  %s2416_s8 = smov 32   ;;  %vm55_vm1 = vcmask 261120   ;;  %s2806_s2 = inlined_call_operand.vmem [shape: f32[32,128], index: 2, kind: input, shape index: {}]   ;;  %s2807_s1 = inlined_call_operand.vmem [shape: f32[128,128], index: 1, kind: input, shape index: {}]   ;;  %s2808_s0 = inlined_call_operand.vmem [shape: f32[8,8,128], index: 0, kind: input, shape index: {}]   ;;  %s2809_s3 = inlined_call_operand.vmem [shape: f32[32,128], index: 3, kind: input, shape index: {}]   ;;  %s2810_s4 = inlined_call_operand.vmem [shape: f32[1,128], index: 4, kind: input, shape index: {}]   ;;  %s2811_s5 = inlined_call_operand.vmem [shape: f32[8,128], index: 5, kind: output, shape index: {}]  }
   0x1   :  { %2081 = vmatprep.subr.bf16.mxu0 %v2412_v0  ;;  %v36_v1 = vld [vmem:[%s2806_s2] sm:$0xff]  ;;  %v37_v2 = vld [vmem:[%s2806_s2 + $0x8] sm:$0xff]  ;;  %v38_v3 = vld [vmem:[%s2806_s2 + $0x10] sm:$0xff]  ;;  %1710 = vmatprep.mubr.msk.f32.mxu0 %vm2413_vm0, %v2414_v4 }
   0x2   :  { %v2459_v5 = vpack.c.bf16 %v37_v2, %v36_v1  ;;  %v39_v6 = vld [vmem:[%s2806_s2 + $0x18] sm:$0xff]  ;;  %2111 = vmatprep.subr.bf16.mxu1 %v2412_v0  ;;  %1756 = vmatprep.mubr.msk.f32.mxu1 %vm2413_vm0, %v2414_v4  ;;  %v20_v8 = vld [vmem:[%s2807_s1] sm:$0xff]  ;;  %v21_v9 = vld [vmem:[%s2807_s1 + $0x8] sm:$0xff] }
   0x3   :  { %v2468_v7 = vpack.c.bf16 %v39_v6, %v38_v3  ;;  %v2480_v10 = vpack.c.bf16 %v21_v9, %v20_v8  ;;  %v22_v11 = vld [vmem:[%s2807_s1 + $0x10] sm:$0xff]  ;;  %v23_v12 = vld [vmem:[%s2807_s1 + $0x18] sm:$0xff]  ;;  %v24_v14 = vld [vmem:[%s2807_s1 + $0x20] sm:$0xff] }
   0x4   :  { %2083 = vmatpush3.bf16.msra.mxu0 %v2459_v5  ;;  %2113 = vmatpush3.bf16.msra.mxu1 %v2459_v5  ;;  %v2493_v13 = vpack.c.bf16 %v23_v12, %v22_v11  ;;  %v25_v15 = vld [vmem:[%s2807_s1 + $0x28] sm:$0xff]  ;;  %v26_v17 = vld [vmem:[%s2807_s1 + $0x30] sm:$0xff]  ;;  %v27_v18 = vld [vmem:[%s2807_s1 + $0x38] sm:$0xff] }
   0x5   :  { %2084 = vmatprep.subr.bf16.mxu0 %v2412_v0  ;;  %2114 = vmatprep.subr.bf16.mxu1 %v2412_v0  ;;  %v2505_v16 = vpack.c.bf16 %v25_v15, %v24_v14  ;;  %v2515_v19 = vpack.c.bf16 %v27_v18, %v26_v17  ;;  %v28_v20 = vld [vmem:[%s2807_s1 + $0x40] sm:$0xff]  ;;  %v29_v21 = vld [vmem:[%s2807_s1 + $0x48] sm:$0xff]  ;;  %v30_v23 = vld [vmem:[%s2807_s1 + $0x50] sm:$0xff] }
   0x6   :  { %v2525_v22 = vpack.c.bf16 %v29_v21, %v28_v20  ;;  %v31_v24 = vld [vmem:[%s2807_s1 + $0x58] sm:$0xff]  ;;  %v32_v26 = vld [vmem:[%s2807_s1 + $0x60] sm:$0xff]  ;;  %v33_v27 = vld [vmem:[%s2807_s1 + $0x68] sm:$0xff] }
   0x7   :  { %v2535_v25 = vpack.c.bf16 %v31_v24, %v30_v23  ;;  %v2545_v28 = vpack.c.bf16 %v33_v27, %v32_v26  ;;  %v34_v29 = vld [vmem:[%s2807_s1 + $0x70] sm:$0xff]  ;;  %v35_v30 = vld [vmem:[%s2807_s1 + $0x78] sm:$0xff]  ;;  %v40_v32 = vld [vmem:[%s2808_s0] sm:$0xff]  ;;  %s2415_s1 = smov 64  }
   0x8   :  { %2086 = vmatpush3.bf16.msra.mxu0 %v2468_v7  ;;  %2116 = vmatpush3.bf16.msra.mxu1 %v2468_v7  ;;  %v2555_v31 = vpack.c.bf16 %v35_v30, %v34_v29  ;;  %v1497_v49 = vld [vmem:[%s2808_s0 + $0x8] sm:$0xff]  ;;  %v1498_v3 = vld [vmem:[%s2808_s0 + $0x10] sm:$0xff]  ;;  %v1499_v30 = vld [vmem:[%s2808_s0 + $0x18] sm:$0xff] }
   0x9   :  { %2087 = vmatprep.subr.bf16.mxu0 %v2412_v0  ;;  %2117 = vmatprep.subr.bf16.mxu1 %v2412_v0 }
   0xb   :  { %1711 = vmatmul.mubr.f32.vlgmr.msra.gmra.mrb[0].mxu0 %v2414_v4 }
   0xc   :  { %2089 = vmatpush3.bf16.msra.mxu0 %v2480_v10  ;;  %1745 = vmatprep.mubr.msk.f32.mxu0 %vm2413_vm0, %v2414_v4 }
   0xd   :  { %2090 = vmatprep.subr.bf16.mxu0 %v2412_v0 }
  0x10   :  { %2092 = vmatpush3.bf16.msra.mxu0 %v2493_v13 }
  0x11   :  { %2093 = vmatprep.subr.bf16.mxu0 %v2412_v0 }
  0x14   :  { %2095 = vmatpush3.bf16.msra.mxu0 %v2505_v16 }
  0x15   :  { %2096 = vmatprep.subr.bf16.mxu0 %v2412_v0 }
  0x18   :  { %2098 = vmatpush3.bf16.msra.mxu0 %v2515_v19 }
  0x19   :  { %2099 = vmatprep.subr.bf16.mxu0 %v2412_v0 }
  0x1c   :  { %2101 = vmatpush3.bf16.msra.mxu0 %v2525_v22 }
  0x1d   :  { %2102 = vmatprep.subr.bf16.mxu0 %v2412_v0 }
  0x20   :  { %2104 = vmatpush3.bf16.msra.mxu0 %v2535_v25 }
  0x21   :  { %2105 = vmatprep.subr.bf16.mxu0 %v2412_v0 }
  0x24   :  { %2107 = vmatpush3.bf16.msra.mxu0 %v2545_v28 }
  0x25   :  { %2108 = vmatprep.subr.bf16.mxu0 %v2412_v0 }
  0x28   :  { %2110 = vmatpush3.bf16.msra.mxu0 %v2555_v31 }
  0x29   :  { %2141 = vmatprep.subr.bf16.mxu0 %v2412_v0 }
  0x2b   :  { %1746 = vmatmul.mubr.f32.vlgmr.msra.gmra.mrb[0].mxu0 %v40_v32 }
  0x2c   :  { %2143 = vmatpush3.bf16.msra.mxu0 %v2459_v5  ;;  %1802 = vmatprep.mubr.msk.f32.mxu0 %vm2413_vm0, %v2414_v4 }
  0x2d   :  { %2144 = vmatprep.subr.bf16.mxu0 %v2412_v0 }
  0x30   :  { %2146 = vmatpush3.bf16.msra.mxu0 %v2468_v7 }
  0x31   :  { %2147 = vmatprep.subr.bf16.mxu0 %v2412_v0 }
  0xfe   :  { %v195_v33 = vpop.f32.mrb[0].mxu0 }
  0xff   :  { %2348 = vtanh.f32 %v195_v33  ;;  %v1747_v34 = vpop.f32.mrb[1].mxu0  ;;  %v1504_v36 = vmul.f32 -1.442695, %v195_v33 }
 0x101   :  { %2350 = vpow2.f32 %v1504_v36 }
 0x109   :  { %v2349_v35 = vpop.eup %2348 }
 0x10a   :  { %208 = vrot.lane.b32.xlu0 %v2349_v35, %s2415_s1 }
 0x10b   :  { %v2351_v37 = vpop.eup %2350 }
 0x10c   :  { %v202_v38 = vadd.f32 1.0, %v2351_v37 }
 0x10e   :  { %2352 = vrcp.f32 %v202_v38 }
 0x118   :  { %v2353_v39 = vpop.eup %2352 }
 0x119   :  { %v206_v42 = vmul.f32 0.0, %v2353_v39 }
 0x17c   :  { %v209_v40 = vpop.permute.xlu0 %208 }
 0x17d   :  { %v211_v41 = vmul.f32 %v2353_v39, %v209_v40 }
 0x17f   :  { %213 = vrot.lane.b32.xlu0 %v211_v41, %s2416_s8 }
 0x1f1   :  { %v214_v43 = vpop.permute.xlu0 %213 }
 0x1f2   :  { %v216_v44 = vadd.f32 %v214_v43, %v206_v42 }
 0x1f4   :  { %2354 = vtanh.f32 %v216_v44 }
 0x1fe   :  { %v2355_v45 = vpop.eup %2354 }
 0x1ff   :  { %219 = vrot.lane.b32.xlu1 %v2355_v45, %s2415_s1 }
 0x271   :  { %v220_v46 = vpop.permute.xlu1 %219 }
 0x272   :  { %v222_v47 = vmul.f32 %v2353_v39, %v220_v46 }
 0x274   :  { %224 = vrot.lane.b32.xlu1 %v222_v47, %s2416_s8 }
 0x2e6   :  { %v225_v48 = vpop.permute.xlu1 %224 }
 0x2e7   :  { %1757 = vmatmul.mubr.msk.f32.vlgmr.msra.gmra.mrb[0].mxu1 %vm55_vm1, %v225_v48  ;;  %v1500_v48 = vld [vmem:[%s2808_s0 + $0x20] sm:$0xff] }
 0x2e8   :  { %2119 = vmatpush3.bf16.msra.mxu1 %v2480_v10  ;;  %1791 = vmatprep.mubr.msk.f32.mxu1 %vm2413_vm0, %v2414_v4 }
 0x2e9   :  { %2120 = vmatprep.subr.bf16.mxu1 %v2412_v0 }
 0x2ec   :  { %2122 = vmatpush3.bf16.msra.mxu1 %v2493_v13 }
 0x2ed   :  { %2123 = vmatprep.subr.bf16.mxu1 %v2412_v0 }
 0x2f0   :  { %2125 = vmatpush3.bf16.msra.mxu1 %v2505_v16 }
 0x2f1   :  { %2126 = vmatprep.subr.bf16.mxu1 %v2412_v0 }
 0x2f4   :  { %2128 = vmatpush3.bf16.msra.mxu1 %v2515_v19 }
 0x2f5   :  { %2129 = vmatprep.subr.bf16.mxu1 %v2412_v0 }
 0x2f8   :  { %2131 = vmatpush3.bf16.msra.mxu1 %v2525_v22 }
 0x2f9   :  { %2132 = vmatprep.subr.bf16.mxu1 %v2412_v0 }
 0x2fc   :  { %2134 = vmatpush3.bf16.msra.mxu1 %v2535_v25 }
 0x2fd   :  { %2135 = vmatprep.subr.bf16.mxu1 %v2412_v0 }
 0x300   :  { %2137 = vmatpush3.bf16.msra.mxu1 %v2545_v28 }
 0x301   :  { %2138 = vmatprep.subr.bf16.mxu1 %v2412_v0 }
 0x304   :  { %2140 = vmatpush3.bf16.msra.mxu1 %v2555_v31 }
 0x305   :  { %2171 = vmatprep.subr.bf16.mxu1 %v2412_v0 }
 0x307   :  { %1792 = vmatmul.mubr.f32.vlgmr.msra.gmra.mrb[0].mxu1 %v1497_v49 }
 0x308   :  { %2173 = vmatpush3.bf16.msra.mxu1 %v2459_v5  ;;  %1848 = vmatprep.mubr.msk.f32.mxu1 %vm2413_vm0, %v2414_v4 }
 0x309   :  { %2174 = vmatprep.subr.bf16.mxu1 %v2412_v0 }
 0x30c   :  { %2176 = vmatpush3.bf16.msra.mxu1 %v2468_v7 }
 0x30d   :  { %2177 = vmatprep.subr.bf16.mxu1 %v2412_v0 }
 0x3da   :  { %v364_v50 = vpop.f32.mrb[0].mxu1 }
 0x3db   :  { %2356 = vtanh.f32 %v364_v50  ;;  %v1793_v51 = vpop.f32.mrb[1].mxu1  ;;  %v1506_v53 = vmul.f32 -1.442695, %v364_v50 }
 0x3dd   :  { %2358 = vpow2.f32 %v1506_v53 }
 0x3e5   :  { %v2357_v52 = vpop.eup %2356 }
 0x3e6   :  { %377 = vrot.lane.b32.xlu0 %v2357_v52, %s2415_s1 }
 0x3e7   :  { %v2359_v54 = vpop.eup %2358 }
 0x3e8   :  { %v371_v55 = vadd.f32 1.0, %v2359_v54 }
 0x3ea   :  { %2360 = vrcp.f32 %v371_v55 }
 0x3f4   :  { %v2361_v56 = vpop.eup %2360 }
 0x3f5   :  { %v375_v59 = vmul.f32 %v2361_v56, %v216_v44 }
 0x458   :  { %v378_v57 = vpop.permute.xlu0 %377 }
 0x459   :  { %v380_v58 = vmul.f32 %v2361_v56, %v378_v57 }
 0x45b   :  { %382 = vrot.lane.b32.xlu1 %v380_v58, %s2416_s8 }
 0x4cd   :  { %v383_v60 = vpop.permute.xlu1 %382 }
 0x4ce   :  { %v385_v61 = vadd.f32 %v383_v60, %v375_v59 }
 0x4d0   :  { %2362 = vtanh.f32 %v385_v61 }
 0x4da   :  { %v2363_v62 = vpop.eup %2362 }
 0x4db   :  { %388 = vrot.lane.b32.xlu0 %v2363_v62, %s2415_s1 }
 0x54d   :  { %v389_v63 = vpop.permute.xlu0 %388 }
 0x54e   :  { %v391_v1 = vmul.f32 %v2361_v56, %v389_v63 }
 0x550   :  { %393 = vrot.lane.b32.xlu1 %v391_v1, %s2416_s8 }
 0x5c2   :  { %v394_v2 = vpop.permute.xlu1 %393 }
 0x5c3   :  { %1803 = vmatmul.mubr.msk.f32.vlgmr.msra.gmra.mrb[2].mxu0 %vm55_vm1, %v394_v2  ;;  %v1501_v2 = vld [vmem:[%s2808_s0 + $0x28] sm:$0xff] }
 0x5c4   :  { %2149 = vmatpush3.bf16.msra.mxu0 %v2480_v10  ;;  %1837 = vmatprep.mubr.msk.f32.mxu0 %vm2413_vm0, %v2414_v4 }
 0x5c5   :  { %2150 = vmatprep.subr.bf16.mxu0 %v2412_v0 }
 0x5c8   :  { %2152 = vmatpush3.bf16.msra.mxu0 %v2493_v13 }
 0x5c9   :  { %2153 = vmatprep.subr.bf16.mxu0 %v2412_v0 }
 0x5cc   :  { %2155 = vmatpush3.bf16.msra.mxu0 %v2505_v16 }
 0x5cd   :  { %2156 = vmatprep.subr.bf16.mxu0 %v2412_v0 }
 0x5d0   :  { %2158 = vmatpush3.bf16.msra.mxu0 %v2515_v19 }
 0x5d1   :  { %2159 = vmatprep.subr.bf16.mxu0 %v2412_v0 }
 0x5d4   :  { %2161 = vmatpush3.bf16.msra.mxu0 %v2525_v22 }
 0x5d5   :  { %2162 = vmatprep.subr.bf16.mxu0 %v2412_v0 }
 0x5d8   :  { %2164 = vmatpush3.bf16.msra.mxu0 %v2535_v25 }
 0x5d9   :  { %2165 = vmatprep.subr.bf16.mxu0 %v2412_v0 }
 0x5dc   :  { %2167 = vmatpush3.bf16.msra.mxu0 %v2545_v28 }
 0x5dd   :  { %2168 = vmatprep.subr.bf16.mxu0 %v2412_v0 }
 0x5e0   :  { %2170 = vmatpush3.bf16.msra.mxu0 %v2555_v31 }
 0x5e1   :  { %2201 = vmatprep.subr.bf16.mxu0 %v2412_v0 }
 0x5e3   :  { %1838 = vmatmul.mubr.f32.vlgmr.msra.gmra.mrb[2].mxu0 %v1498_v3 }
 0x5e4   :  { %2203 = vmatpush3.bf16.msra.mxu0 %v2459_v5  ;;  %1894 = vmatprep.mubr.msk.f32.mxu0 %vm2413_vm0, %v2414_v4 }
 0x5e5   :  { %2204 = vmatprep.subr.bf16.mxu0 %v2412_v0 }
 0x5e8   :  { %2206 = vmatpush3.bf16.msra.mxu0 %v2468_v7 }
 0x5e9   :  { %2207 = vmatprep.subr.bf16.mxu0 %v2412_v0 }
 0x6b6   :  { %v533_v6 = vpop.f32.mrb[2].mxu0 }
 0x6b7   :  { %2364 = vtanh.f32 %v533_v6  ;;  %v1839_v8 = vpop.f32.mrb[3].mxu0  ;;  %v1508_v11 = vmul.f32 -1.442695, %v533_v6 }
 0x6b9   :  { %2366 = vpow2.f32 %v1508_v11 }
 0x6c1   :  { %v2365_v9 = vpop.eup %2364 }
 0x6c2   :  { %546 = vrot.lane.b32.xlu0 %v2365_v9, %s2415_s1 }
 0x6c3   :  { %v2367_v12 = vpop.eup %2366 }
 0x6c4   :  { %v540_v14 = vadd.f32 1.0, %v2367_v12 }
 0x6c6   :  { %2368 = vrcp.f32 %v540_v14 }
 0x6d0   :  { %v2369_v15 = vpop.eup %2368 }
 0x6d1   :  { %v544_v20 = vmul.f32 %v2369_v15, %v385_v61 }
 0x734   :  { %v547_v17 = vpop.permute.xlu0 %546 }
 0x735   :  { %v549_v18 = vmul.f32 %v2369_v15, %v547_v17 }
 0x737   :  { %551 = vrot.lane.b32.xlu1 %v549_v18, %s2416_s8 }
 0x7a9   :  { %v552_v21 = vpop.permute.xlu1 %551 }
 0x7aa   :  { %v554_v23 = vadd.f32 %v552_v21, %v544_v20 }
 0x7ac   :  { %2370 = vtanh.f32 %v554_v23 }
 0x7b6   :  { %v2371_v24 = vpop.eup %2370 }
 0x7b7   :  { %557 = vrot.lane.b32.xlu0 %v2371_v24, %s2415_s1 }
 0x829   :  { %v558_v26 = vpop.permute.xlu0 %557 }
 0x82a   :  { %v560_v27 = vmul.f32 %v2369_v15, %v558_v26  ;;  %v1502_v26 = vld [vmem:[%s2808_s0 + $0x30] sm:$0xff] }
 0x82c   :  { %562 = vrot.lane.b32.xlu1 %v560_v27, %s2416_s8 }
 0x89e   :  { %v563_v29 = vpop.permute.xlu1 %562 }
 0x89f   :  { %1849 = vmatmul.mubr.msk.f32.vlgmr.msra.gmra.mrb[2].mxu1 %vm55_vm1, %v563_v29 }
 0x8a0   :  { %2179 = vmatpush3.bf16.msra.mxu1 %v2480_v10  ;;  %1883 = vmatprep.mubr.msk.f32.mxu1 %vm2413_vm0, %v2414_v4 }
 0x8a1   :  { %2180 = vmatprep.subr.bf16.mxu1 %v2412_v0 }
 0x8a4   :  { %2182 = vmatpush3.bf16.msra.mxu1 %v2493_v13 }
 0x8a5   :  { %2183 = vmatprep.subr.bf16.mxu1 %v2412_v0 }
 0x8a8   :  { %2185 = vmatpush3.bf16.msra.mxu1 %v2505_v16 }
 0x8a9   :  { %2186 = vmatprep.subr.bf16.mxu1 %v2412_v0 }
 0x8ac   :  { %2188 = vmatpush3.bf16.msra.mxu1 %v2515_v19 }
 0x8ad   :  { %2189 = vmatprep.subr.bf16.mxu1 %v2412_v0 }
 0x8b0   :  { %2191 = vmatpush3.bf16.msra.mxu1 %v2525_v22 }
 0x8b1   :  { %2192 = vmatprep.subr.bf16.mxu1 %v2412_v0 }
 0x8b4   :  { %2194 = vmatpush3.bf16.msra.mxu1 %v2535_v25 }
 0x8b5   :  { %2195 = vmatprep.subr.bf16.mxu1 %v2412_v0 }
 0x8b8   :  { %2197 = vmatpush3.bf16.msra.mxu1 %v2545_v28 }
 0x8b9   :  { %2198 = vmatprep.subr.bf16.mxu1 %v2412_v0 }
 0x8bc   :  { %2200 = vmatpush3.bf16.msra.mxu1 %v2555_v31 }
 0x8bd   :  { %2231 = vmatprep.subr.bf16.mxu1 %v2412_v0 }
 0x8bf   :  { %1884 = vmatmul.mubr.f32.vlgmr.msra.gmra.mrb[2].mxu1 %v1499_v30 }
 0x8c0   :  { %2233 = vmatpush3.bf16.msra.mxu1 %v2459_v5  ;;  %1940 = vmatprep.mubr.msk.f32.mxu1 %vm2413_vm0, %v2414_v4 }
 0x8c1   :  { %2234 = vmatprep.subr.bf16.mxu1 %v2412_v0 }
 0x8c4   :  { %2236 = vmatpush3.bf16.msra.mxu1 %v2468_v7 }
 0x8c5   :  { %2237 = vmatprep.subr.bf16.mxu1 %v2412_v0 }
 0x992   :  { %v702_v32 = vpop.f32.mrb[2].mxu1 }
 0x993   :  { %2372 = vtanh.f32 %v702_v32  ;;  %v1885_v33 = vpop.f32.mrb[3].mxu1  ;;  %v1510_v35 = vmul.f32 -1.442695, %v702_v32 }
 0x995   :  { %2374 = vpow2.f32 %v1510_v35 }
 0x99d   :  { %v2373_v34 = vpop.eup %2372 }
 0x99e   :  { %715 = vrot.lane.b32.xlu0 %v2373_v34, %s2415_s1 }
 0x99f   :  { %v2375_v36 = vpop.eup %2374 }
 0x9a0   :  { %v709_v37 = vadd.f32 1.0, %v2375_v36 }
 0x9a2   :  { %2376 = vrcp.f32 %v709_v37 }
 0x9ac   :  { %v2377_v38 = vpop.eup %2376 }
 0x9ad   :  { %v713_v41 = vmul.f32 %v2377_v38, %v554_v23 }
 0xa10   :  { %v716_v39 = vpop.permute.xlu0 %715 }
 0xa11   :  { %v718_v40 = vmul.f32 %v2377_v38, %v716_v39 }
 0xa13   :  { %720 = vrot.lane.b32.xlu1 %v718_v40, %s2416_s8 }
 0xa85   :  { %v721_v42 = vpop.permute.xlu1 %720 }
 0xa86   :  { %v723_v43 = vadd.f32 %v721_v42, %v713_v41 }
 0xa88   :  { %2378 = vtanh.f32 %v723_v43 }
 0xa92   :  { %v2379_v44 = vpop.eup %2378 }
 0xa93   :  { %726 = vrot.lane.b32.xlu0 %v2379_v44, %s2415_s1 }
 0xb05   :  { %v727_v45 = vpop.permute.xlu0 %726 }
 0xb06   :  { %v729_v46 = vmul.f32 %v2377_v38, %v727_v45 }
 0xb08   :  { %731 = vrot.lane.b32.xlu1 %v729_v46, %s2416_s8 }
 0xb7a   :  { %v732_v47 = vpop.permute.xlu1 %731 }
 0xb7b   :  { %1895 = vmatmul.mubr.msk.f32.vlgmr.msra.gmra.mrb[4].mxu0 %vm55_vm1, %v732_v47 }
 0xb7c   :  { %2209 = vmatpush3.bf16.msra.mxu0 %v2480_v10  ;;  %1929 = vmatprep.mubr.msk.f32.mxu0 %vm2413_vm0, %v2414_v4 }
 0xb7d   :  { %2210 = vmatprep.subr.bf16.mxu0 %v2412_v0 }
 0xb80   :  { %2212 = vmatpush3.bf16.msra.mxu0 %v2493_v13 }
 0xb81   :  { %2213 = vmatprep.subr.bf16.mxu0 %v2412_v0 }
 0xb84   :  { %2215 = vmatpush3.bf16.msra.mxu0 %v2505_v16 }
 0xb85   :  { %2216 = vmatprep.subr.bf16.mxu0 %v2412_v0 }
 0xb88   :  { %2218 = vmatpush3.bf16.msra.mxu0 %v2515_v19 }
 0xb89   :  { %2219 = vmatprep.subr.bf16.mxu0 %v2412_v0 }
 0xb8c   :  { %2221 = vmatpush3.bf16.msra.mxu0 %v2525_v22 }
 0xb8d   :  { %2222 = vmatprep.subr.bf16.mxu0 %v2412_v0 }
 0xb90   :  { %2224 = vmatpush3.bf16.msra.mxu0 %v2535_v25 }
 0xb91   :  { %2225 = vmatprep.subr.bf16.mxu0 %v2412_v0 }
 0xb94   :  { %2227 = vmatpush3.bf16.msra.mxu0 %v2545_v28 }
 0xb95   :  { %2228 = vmatprep.subr.bf16.mxu0 %v2412_v0 }
 0xb98   :  { %2230 = vmatpush3.bf16.msra.mxu0 %v2555_v31 }
 0xb99   :  { %2261 = vmatprep.subr.bf16.mxu0 %v2412_v0 }
 0xb9b   :  { %1930 = vmatmul.mubr.f32.vlgmr.msra.gmra.mrb[4].mxu0 %v1500_v48 }
 0xb9c   :  { %2263 = vmatpush3.bf16.msra.mxu0 %v2459_v5  ;;  %1986 = vmatprep.mubr.msk.f32.mxu0 %vm2413_vm0, %v2414_v4 }
 0xb9d   :  { %2264 = vmatprep.subr.bf16.mxu0 %v2412_v0 }
 0xba0   :  { %2266 = vmatpush3.bf16.msra.mxu0 %v2468_v7 }
 0xba1   :  { %2267 = vmatprep.subr.bf16.mxu0 %v2412_v0 }
 0xc6e   :  { %v871_v49 = vpop.f32.mrb[4].mxu0 }
 0xc6f   :  { %2380 = vtanh.f32 %v871_v49  ;;  %v1931_v50 = vpop.f32.mrb[5].mxu0  ;;  %v1512_v52 = vmul.f32 -1.442695, %v871_v49  ;;  %v1406_v49 = vld [vmem:[%s2809_s3] sm:$0xff] }
 0xc70   :  { %v1407_v50 = vld [vmem:[%s2809_s3 + $0x8] sm:$0xff] }
 0xc71   :  { %2382 = vpow2.f32 %v1512_v52  ;;  %v2322_v52 = vpack.c.bf16 %v1407_v50, %v1406_v49 }
 0xc79   :  { %v2381_v51 = vpop.eup %2380 }
 0xc7a   :  { %884 = vrot.lane.b32.xlu0 %v2381_v51, %s2415_s1  ;;  %v1408_v51 = vld [vmem:[%s2809_s3 + $0x10] sm:$0xff] }
 0xc7b   :  { %v2383_v53 = vpop.eup %2382 }
 0xc7c   :  { %v878_v54 = vadd.f32 1.0, %v2383_v53  ;;  %v1409_v53 = vld [vmem:[%s2809_s3 + $0x18] sm:$0xff] }
 0xc7e   :  { %2384 = vrcp.f32 %v878_v54  ;;  %v2325_v54 = vpack.c.bf16 %v1409_v53, %v1408_v51 }
 0xc88   :  { %v2385_v55 = vpop.eup %2384 }
 0xc89   :  { %v882_v58 = vmul.f32 %v2385_v55, %v723_v43 }
 0xcec   :  { %v885_v56 = vpop.permute.xlu0 %884 }
 0xced   :  { %v887_v57 = vmul.f32 %v2385_v55, %v885_v56 }
 0xcef   :  { %889 = vrot.lane.b32.xlu1 %v887_v57, %s2416_s8 }
 0xd61   :  { %v890_v59 = vpop.permute.xlu1 %889 }
 0xd62   :  { %v892_v60 = vadd.f32 %v890_v59, %v882_v58  ;;  %v1519_v59 = vld [vmem:[%s2810_s4] ss:$0 sm:$0xff] }
 0xd64   :  { %2386 = vtanh.f32 %v892_v60 }
 0xd6e   :  { %v2387_v61 = vpop.eup %2386 }
 0xd6f   :  { %895 = vrot.lane.b32.xlu0 %v2387_v61, %s2415_s1 }
 0xde1   :  { %v896_v62 = vpop.permute.xlu0 %895 }
 0xde2   :  { %v898_v63 = vmul.f32 %v2385_v55, %v896_v62 }
 0xde4   :  { %900 = vrot.lane.b32.xlu1 %v898_v63, %s2416_s8 }
 0xe56   :  { %v901_v1 = vpop.permute.xlu1 %900 }
 0xe57   :  { %1941 = vmatmul.mubr.msk.f32.vlgmr.msra.gmra.mrb[4].mxu1 %vm55_vm1, %v901_v1 }
 0xe58   :  { %2239 = vmatpush3.bf16.msra.mxu1 %v2480_v10  ;;  %1975 = vmatprep.mubr.msk.f32.mxu1 %vm2413_vm0, %v2414_v4 }
 0xe59   :  { %2240 = vmatprep.subr.bf16.mxu1 %v2412_v0 }
 0xe5c   :  { %2242 = vmatpush3.bf16.msra.mxu1 %v2493_v13 }
 0xe5d   :  { %2243 = vmatprep.subr.bf16.mxu1 %v2412_v0 }
 0xe60   :  { %2245 = vmatpush3.bf16.msra.mxu1 %v2505_v16 }
 0xe61   :  { %2246 = vmatprep.subr.bf16.mxu1 %v2412_v0 }
 0xe64   :  { %2248 = vmatpush3.bf16.msra.mxu1 %v2515_v19 }
 0xe65   :  { %2249 = vmatprep.subr.bf16.mxu1 %v2412_v0 }
 0xe68   :  { %2251 = vmatpush3.bf16.msra.mxu1 %v2525_v22 }
 0xe69   :  { %2252 = vmatprep.subr.bf16.mxu1 %v2412_v0 }
 0xe6c   :  { %2254 = vmatpush3.bf16.msra.mxu1 %v2535_v25 }
 0xe6d   :  { %2255 = vmatprep.subr.bf16.mxu1 %v2412_v0 }
 0xe70   :  { %2257 = vmatpush3.bf16.msra.mxu1 %v2545_v28 }
 0xe71   :  { %2258 = vmatprep.subr.bf16.mxu1 %v2412_v0 }
 0xe74   :  { %2260 = vmatpush3.bf16.msra.mxu1 %v2555_v31 }
 0xe75   :  { %2291 = vmatprep.subr.bf16.mxu1 %v2412_v0 }
 0xe77   :  { %1976 = vmatmul.mubr.f32.vlgmr.msra.gmra.mrb[4].mxu1 %v1501_v2 }
 0xe78   :  { %2293 = vmatpush3.bf16.msra.mxu1 %v2459_v5  ;;  %2032 = vmatprep.mubr.msk.f32.mxu1 %vm2413_vm0, %v2414_v4 }
 0xe79   :  { %2294 = vmatprep.subr.bf16.mxu1 %v2412_v0 }
 0xe7c   :  { %2296 = vmatpush3.bf16.msra.mxu1 %v2468_v7 }
 0xe7d   :  { %2297 = vmatprep.subr.bf16.mxu1 %v2412_v0 }
 0xf4a   :  { %v1040_v3 = vpop.f32.mrb[4].mxu1 }
 0xf4b   :  { %2388 = vtanh.f32 %v1040_v3  ;;  %v1977_v6 = vpop.f32.mrb[5].mxu1  ;;  %v1514_v9 = vmul.f32 -1.442695, %v1040_v3 }
 0xf4d   :  { %2390 = vpow2.f32 %v1514_v9 }
 0xf55   :  { %v2389_v8 = vpop.eup %2388 }
 0xf56   :  { %1053 = vrot.lane.b32.xlu0 %v2389_v8, %s2415_s1 }
 0xf57   :  { %v2391_v11 = vpop.eup %2390 }
 0xf58   :  { %v1047_v12 = vadd.f32 1.0, %v2391_v11 }
 0xf5a   :  { %2392 = vrcp.f32 %v1047_v12 }
 0xf64   :  { %v2393_v5 = vpop.eup %2392 }
 0xf65   :  { %v1051_v17 = vmul.f32 %v2393_v5, %v892_v60 }
 0xfc8   :  { %v1054_v14 = vpop.permute.xlu0 %1053 }
 0xfc9   :  { %v1056_v15 = vmul.f32 %v2393_v5, %v1054_v14 }
 0xfcb   :  { %1058 = vrot.lane.b32.xlu1 %v1056_v15, %s2416_s8 }
0x103d   :  { %v1059_v7 = vpop.permute.xlu1 %1058 }
0x103e   :  { %v1061_v18 = vadd.f32 %v1059_v7, %v1051_v17 }
0x1040   :  { %2394 = vtanh.f32 %v1061_v18 }
0x104a   :  { %v2395_v20 = vpop.eup %2394 }
0x104b   :  { %1064 = vrot.lane.b32.xlu0 %v2395_v20, %s2415_s1 }
0x10bd   :  { %v1065_v21 = vpop.permute.xlu0 %1064 }
0x10be   :  { %v1067_v23 = vmul.f32 %v2393_v5, %v1065_v21 }
0x10c0   :  { %1069 = vrot.lane.b32.xlu1 %v1067_v23, %s2416_s8 }
0x1132   :  { %v1070_v24 = vpop.permute.xlu1 %1069 }
0x1133   :  { %1987 = vmatmul.mubr.msk.f32.vlgmr.msra.gmra.mrb[6].mxu0 %vm55_vm1, %v1070_v24 }
0x1134   :  { %2269 = vmatpush3.bf16.msra.mxu0 %v2480_v10  ;;  %2021 = vmatprep.mubr.msk.f32.mxu0 %vm2413_vm0, %v2414_v4 }
0x1135   :  { %2270 = vmatprep.subr.bf16.mxu0 %v2412_v0 }
0x1138   :  { %2272 = vmatpush3.bf16.msra.mxu0 %v2493_v13 }
0x1139   :  { %2273 = vmatprep.subr.bf16.mxu0 %v2412_v0 }
0x113c   :  { %2275 = vmatpush3.bf16.msra.mxu0 %v2505_v16 }
0x113d   :  { %2276 = vmatprep.subr.bf16.mxu0 %v2412_v0 }
0x1140   :  { %2278 = vmatpush3.bf16.msra.mxu0 %v2515_v19 }
0x1141   :  { %2279 = vmatprep.subr.bf16.mxu0 %v2412_v0 }
0x1144   :  { %2281 = vmatpush3.bf16.msra.mxu0 %v2525_v22 }
0x1145   :  { %2282 = vmatprep.subr.bf16.mxu0 %v2412_v0 }
0x1148   :  { %2284 = vmatpush3.bf16.msra.mxu0 %v2535_v25 }
0x1149   :  { %2285 = vmatprep.subr.bf16.mxu0 %v2412_v0 }
0x114c   :  { %2287 = vmatpush3.bf16.msra.mxu0 %v2545_v28 }
0x114d   :  { %2288 = vmatprep.subr.bf16.mxu0 %v2412_v0 }
0x1150   :  { %2290 = vmatpush3.bf16.msra.mxu0 %v2555_v31 }
0x1151   :  { %2321 = vmatprep.subr.bf16.mxu0 %v2412_v0 }
0x1153   :  { %2022 = vmatmul.mubr.f32.vlgmr.msra.gmra.mrb[6].mxu0 %v1502_v26 }
0x1154   :  { %2078 = vmatprep.mubr.msk.f32.mxu0 %vm2413_vm0, %v2414_v4  ;;  %2323 = vmatpush3.bf16.msra.mxu0 %v2322_v52 }
0x1155   :  { %2324 = vmatprep.subr.bf16.mxu0 %v2412_v0 }
0x1158   :  { %2326 = vmatpush3.bf16.msra.mxu0 %v2325_v54 }
0x1226   :  { %v1209_v27 = vpop.f32.mrb[6].mxu0 }
0x1227   :  { %2396 = vtanh.f32 %v1209_v27  ;;  %v2023_v29 = vpop.f32.mrb[7].mxu0  ;;  %v1516_v32 = vmul.f32 -1.442695, %v1209_v27 }
0x1229   :  { %2398 = vpow2.f32 %v1516_v32 }
0x1231   :  { %v2397_v30 = vpop.eup %2396 }
0x1232   :  { %1222 = vrot.lane.b32.xlu0 %v2397_v30, %s2415_s1 }
0x1233   :  { %v2399_v33 = vpop.eup %2398 }
0x1234   :  { %v1216_v34 = vadd.f32 1.0, %v2399_v33 }
0x1236   :  { %2400 = vrcp.f32 %v1216_v34 }
0x1240   :  { %v2401_v35 = vpop.eup %2400 }
0x1241   :  { %v1220_v38 = vmul.f32 %v2401_v35, %v1061_v18 }
0x12a4   :  { %v1223_v36 = vpop.permute.xlu0 %1222 }
0x12a5   :  { %v1225_v37 = vmul.f32 %v2401_v35, %v1223_v36 }
0x12a7   :  { %1227 = vrot.lane.b32.xlu1 %v1225_v37, %s2416_s8 }
0x1319   :  { %v1228_v39 = vpop.permute.xlu1 %1227 }
0x131a   :  { %v1230_v40 = vadd.f32 %v1228_v39, %v1220_v38 }
0x131c   :  { %2402 = vtanh.f32 %v1230_v40 }
0x1326   :  { %v2403_v41 = vpop.eup %2402 }
0x1327   :  { %1233 = vrot.lane.b32.xlu0 %v2403_v41, %s2415_s1 }
0x1399   :  { %v1234_v42 = vpop.permute.xlu0 %1233 }
0x139a   :  { %v1236_v43 = vmul.f32 %v2401_v35, %v1234_v42 }
0x139c   :  { %1238 = vrot.lane.b32.xlu1 %v1236_v43, %s2416_s8 }
0x140e   :  { %v1239_v44 = vpop.permute.xlu1 %1238 }
0x140f   :  { %2033 = vmatmul.mubr.msk.f32.vlgmr.msra.gmra.mrb[6].mxu1 %vm55_vm1, %v1239_v44 }
0x1410   :  { %2299 = vmatpush3.bf16.msra.mxu1 %v2480_v10  ;;  %2067 = vmatprep.mubr.msk.f32.mxu1 %vm2413_vm0, %v2414_v4  ;;  %v1503_v4 = vld [vmem:[%s2808_s0 + $0x38] sm:$0xff] }
0x1411   :  { %2300 = vmatprep.subr.bf16.mxu1 %v2412_v0 }
0x1414   :  { %2302 = vmatpush3.bf16.msra.mxu1 %v2493_v13 }
0x1415   :  { %2303 = vmatprep.subr.bf16.mxu1 %v2412_v0 }
0x1418   :  { %2305 = vmatpush3.bf16.msra.mxu1 %v2505_v16 }
0x1419   :  { %2306 = vmatprep.subr.bf16.mxu1 %v2412_v0 }
0x141c   :  { %2308 = vmatpush3.bf16.msra.mxu1 %v2515_v19 }
0x141d   :  { %2309 = vmatprep.subr.bf16.mxu1 %v2412_v0 }
0x1420   :  { %2311 = vmatpush3.bf16.msra.mxu1 %v2525_v22 }
0x1421   :  { %2312 = vmatprep.subr.bf16.mxu1 %v2412_v0 }
0x1424   :  { %2314 = vmatpush3.bf16.msra.mxu1 %v2535_v25 }
0x1425   :  { %2315 = vmatprep.subr.bf16.mxu1 %v2412_v0 }
0x1428   :  { %2317 = vmatpush3.bf16.msra.mxu1 %v2545_v28 }
0x1429   :  { %2318 = vmatprep.subr.bf16.mxu1 %v2412_v0 }
0x142c   :  { %2320 = vmatpush3.bf16.msra.mxu1 %v2555_v31 }
0x142f   :  { %2068 = vmatmul.mubr.f32.vlgmr.msra.gmra.mrb[6].mxu1 %v1503_v4 }
0x1502   :  { %v1378_v10 = vpop.f32.mrb[6].mxu1 }
0x1503   :  { %2404 = vtanh.f32 %v1378_v10  ;;  %v2069_v13 = vpop.f32.mrb[7].mxu1  ;;  %v1518_v19 = vmul.f32 -1.442695, %v1378_v10 }
0x1505   :  { %2406 = vpow2.f32 %v1518_v19 }
0x150d   :  { %v2405_v16 = vpop.eup %2404 }
0x150e   :  { %1391 = vrot.lane.b32.xlu0 %v2405_v16, %s2415_s1 }
0x150f   :  { %v2407_v22 = vpop.eup %2406 }
0x1510   :  { %v1385_v25 = vadd.f32 1.0, %v2407_v22 }
0x1512   :  { %2408 = vrcp.f32 %v1385_v25 }
0x151c   :  { %v2409_v28 = vpop.eup %2408 }
0x151d   :  { %v1389_v31 = vmul.f32 %v2409_v28, %v1230_v40 }
0x1580   :  { %v1392_v45 = vpop.permute.xlu0 %1391 }
0x1581   :  { %v1394_v46 = vmul.f32 %v2409_v28, %v1392_v45 }
0x1583   :  { %1396 = vrot.lane.b32.xlu1 %v1394_v46, %s2416_s8 }
0x15f5   :  { %v1397_v47 = vpop.permute.xlu1 %1396 }
0x15f6   :  { %v1399_v48 = vadd.f32 %v1397_v47, %v1389_v31 }
0x15f8   :  { %2410 = vtanh.f32 %v1399_v48 }
0x1602   :  { %v2411_v55 = vpop.eup %2410 }
0x1603   :  { %1402 = vrot.lane.b32.xlu0 %v2411_v55, %s2415_s1 }
0x1675   :  { %v1403_v56 = vpop.permute.xlu0 %1402 }
0x1676   :  { %v1405_v57 = vmul.f32 %v2409_v28, %v1403_v56 }
0x1678   :  { %1418 = vrot.lane.b32.xlu1 %v1405_v57, %s2416_s8 }
0x16ea   :  { %v1419_v58 = vpop.permute.xlu1 %1418 }
0x16eb   :  { %2079 = vmatmul.mubr.msk.f32.vlgmr.msra.gmra.mrb[8].mxu0 %vm55_vm1, %v1419_v58 }
0x17be   :  { %v1488_v60 = vpop.f32.mrb[8].mxu0 }
0x17bf   :  { %v1489_v61 = vadd.f32 %v1519_v59, %v1488_v60  ;;  %v2080_v62 = vpop.f32.mrb[9].mxu0 }
0x17c1   :  { %1492 = vst [vmem:[%s2811_s5] sm:$0xff] %v1489_v61 }

</bundles_post_ra>
